<compile_context>
chip_gen: v7x
topology: tpu7x:2x2x1
jax: 0.10.0
libtpu: 0.0.40
codegen_flags: <defaults>
</compile_context>

<pallas_src>
import jax
import jax.numpy as jnp
from jax.experimental import pallas as pl
from jax.experimental.pallas import tpu as pltpu

_LANE = 128
_SUBLANE = 8
_MIN_PAD = _SUBLANE * _LANE  # 1024 elements = one f32 vreg footprint

# Whole-tensor-resident path is used up to 1M elements (4 MiB f32): input +
# f32 intermediates + output stay comfortably inside the 32 MiB scoped VMEM
# default on v5e/v6e/v7x without raising vmem_limit_bytes.
_SINGLE_BLOCK_MAX_ELEMS = 1 << 20

# Tiled path: (512, 1024) f32 tile = 2 MiB -> <= ~12 MiB live with double
# buffering and intermediates, safe on all generations (incl. v7x 64 MiB VMEM).
_TILE_ROWS = 512
_TILE_COLS = 1024


def _round_up(n, m):
    return ((n + m - 1) // m) * m


# ---------------------------------------------------------------------------
# Small path: whole (padded, lane-dense) tensor in one VMEM block, no grid.
# ---------------------------------------------------------------------------
def _softmax_single_block_kernel(x_ref, o_ref):
    x = x_ref[...].astype(jnp.float32)          # single upcast
    exp_x = jnp.exp(x)                          # EUP
    sum_exp = jnp.sum(exp_x, axis=(0, 1), keepdims=True)   # (1,1) full reduce
    inv = pl.reciprocal(sum_exp, approx=False)  # one reciprocal, not N divides
    o_ref[...] = (exp_x * inv).astype(o_ref.dtype)          # single downcast


def _softmax_single_block(flat1d):
    n = flat1d.shape[0]
    dtype = flat1d.dtype
    n_pad = _round_up(n, _MIN_PAD)
    if n_pad != n:
        # exp(-inf) == 0 -> global sum unchanged; padding sliced off below.
        flat1d = jnp.pad(flat1d, (0, n_pad - n), constant_values=-jnp.inf)
    # Lane-dense slab: all 8 sublanes used, last dim a multiple of 128.
    flat = flat1d.reshape(_SUBLANE, n_pad // _SUBLANE)

    out = pl.pallas_call(
        _softmax_single_block_kernel,
        out_shape=jax.ShapeDtypeStruct(flat.shape, dtype),
        in_specs=[pl.BlockSpec(memory_space=pltpu.MemorySpace.VMEM)],
        out_specs=pl.BlockSpec(memory_space=pltpu.MemorySpace.VMEM),
    )(flat)
    return out.reshape(-1)[:n]


# ---------------------------------------------------------------------------
# Large path: tiled two-pass (sum of exp, then scale), pipelined over a grid.
# ---------------------------------------------------------------------------
def _sum_exp_kernel(x_ref, sum_ref):
    # Output block index is constant across the ("arbitrary") grid axis, so
    # sum_ref stays resident in VMEM and acts as the accumulator.
    @pl.when(pl.program_id(0) == 0)
    def _init():
        sum_ref[...] = jnp.zeros_like(sum_ref)

    x = x_ref[...].astype(jnp.float32)
    sum_ref[...] += jnp.sum(jnp.exp(x), axis=(0, 1), keepdims=True)


def _scale_kernel(sum_ref, x_ref, o_ref):
    inv = pl.reciprocal(sum_ref[...], approx=False)   # (1,1) f32
    x = x_ref[...].astype(jnp.float32)
    o_ref[...] = (jnp.exp(x) * inv).astype(o_ref.dtype)


def _softmax_tiled(flat1d, tile_rows, tile_cols):
    n = flat1d.shape[0]
    dtype = flat1d.dtype
    block_elems = tile_rows * tile_cols
    n_pad = _round_up(n, block_elems)
    if n_pad != n:
        flat1d = jnp.pad(flat1d, (0, n_pad - n), constant_values=-jnp.inf)

    rows = n_pad // tile_cols
    flat = flat1d.reshape(rows, tile_cols)
    grid = (rows // tile_rows,)

    # Pass 1: global sum of exp(x), accumulated across the grid.
    sum_exp = pl.pallas_call(
        _sum_exp_kernel,
        out_shape=jax.ShapeDtypeStruct((1, 1), jnp.float32),
        grid=grid,
        in_specs=[pl.BlockSpec((tile_rows, tile_cols), lambda i: (i, 0))],
        out_specs=pl.BlockSpec((1, 1), lambda i: (0, 0)),
        compiler_params=pltpu.CompilerParams(
            dimension_semantics=("arbitrary",)),
    )(flat)

    # Pass 2: recompute exp tile-by-tile and scale; output aliases the padded
    # input buffer so no extra HBM allocation is needed.
    out = pl.pallas_call(
        _scale_kernel,
        out_shape=jax.ShapeDtypeStruct((rows, tile_cols), dtype),
        grid=grid,
        in_specs=[pl.BlockSpec((1, 1), lambda i: (0, 0)),
                  pl.BlockSpec((tile_rows, tile_cols), lambda i: (i, 0))],
        out_specs=pl.BlockSpec((tile_rows, tile_cols), lambda i: (i, 0)),
        input_output_aliases={1: 0},
        compiler_params=pltpu.CompilerParams(
            dimension_semantics=("parallel",)),
    )(sum_exp, flat)

    return out.reshape(-1)[:n]


# ---------------------------------------------------------------------------
# Public wrapper.
# ---------------------------------------------------------------------------
def global_softmax(x, *, force_tiled=False,
                   tile_rows=_TILE_ROWS, tile_cols=_TILE_COLS):
    """exp(x) / sum(exp(x)) over all elements, matching the PyTorch module."""
    orig_shape = x.shape
    n = x.size
    flat1d = x.reshape(-1)

    if force_tiled or n > _SINGLE_BLOCK_MAX_ELEMS:
        out1d = _softmax_tiled(flat1d, tile_rows, tile_cols)
    else:
        out1d = _softmax_single_block(flat1d)

    return out1d.reshape(orig_shape)


if __name__ == "__main__":
    key_a, key_b = jax.random.split(jax.random.PRNGKey(0))

    # Small NCHW input: batch=2, channels=4, spatial=16x16 -> single-block path.
    x = jax.random.normal(key_a, (2, 4, 16, 16), dtype=jnp.float32)
    y = jax.jit(global_softmax)(x)
    jax.block_until_ready(y)

    exp_x = jnp.exp(x)
    y_ref = exp_x / jnp.sum(exp_x)
    assert y.shape == x.shape and y.dtype == x.dtype
    assert jnp.allclose(y, y_ref, rtol=1e-6, atol=1e-7)
    assert jnp.allclose(jnp.sum(y), 1.0, rtol=1e-5)

    # Also exercise the tiled two-pass path with small tiles and a
    # non-tile-aligned element count (tests -inf padding + accumulation).
    x2 = jax.random.normal(key_b, (2, 3, 17, 19), dtype=jnp.float32)
    tiled_fn = jax.jit(
        lambda a: global_softmax(a, force_tiled=True, tile_rows=8, tile_cols=128))
    y2 = tiled_fn(x2)
    jax.block_until_ready(y2)

    exp_x2 = jnp.exp(x2)
    y2_ref = exp_x2 / jnp.sum(exp_x2)
    assert y2.shape == x2.shape and y2.dtype == x2.dtype
    assert jnp.allclose(y2, y2_ref, rtol=1e-5, atol=1e-7)
    assert jnp.allclose(jnp.sum(y2), 1.0, rtol=1e-5)

    print("KERNEL_OK")
</pallas_src>

<mosaic_0001>
module attributes {stable_mosaic.version = 11 : i64} {
  func.func @_softmax_single_block_kernel(%arg0: memref<8x256xf32, #tpu.memory_space<vmem>>, %arg1: memref<8x256xf32, #tpu.memory_space<vmem>>) attributes {dimension_semantics = [], scalar_prefetch = 0 : i64, scratch_operands = 0 : i64, tpu.core_type = #tpu.core_type<tc>} {
    %c0 = arith.constant 0 : index
    %c0_0 = arith.constant 0 : index
    %0 = vector.load %arg0[%c0, %c0_0] : memref<8x256xf32, #tpu.memory_space<vmem>>, vector<8x256xf32>
    %1 = math.exp %0 : vector<8x256xf32>
    %2 = vector.shape_cast %1 : vector<8x256xf32> to vector<1x8x256xf32>
    %cst = arith.constant dense<0.000000e+00> : vector<1xf32>
    %3 = vector.multi_reduction <add>, %2, %cst [1, 2] : vector<1x8x256xf32> to vector<1xf32>
    %4 = vector.shape_cast %3 : vector<1xf32> to vector<1x1x1xf32>
    %5 = vector.extract %4[0, 0, 0] : f32 from vector<1x1x1xf32>
    %6 = vector.broadcast %5 : f32 to vector<1x1xf32>
    %7 = tpu.reciprocal %6 : vector<1x1xf32> -> vector<1x1xf32>
    %8 = vector.broadcast %7 : vector<1x1xf32> to vector<8x256xf32>
    %9 = arith.mulf %1, %8 : vector<8x256xf32>
    %c0_1 = arith.constant 0 : index
    %c0_2 = arith.constant 0 : index
    %10 = vector.load %arg1[%c0_1, %c0_2] : memref<8x256xf32, #tpu.memory_space<vmem>>, vector<8x256xf32>
    tpu.vector_store %arg1[%c0_1, %c0_2], %9 {strides = array<i32>} : memref<8x256xf32, #tpu.memory_space<vmem>>, vector<8x256xf32>,
    return
  }
}

</mosaic_0001>

<bundles_post_ra>
// kernel: global_softmax.1
= control target key start
LH: loop header
LB: loop body
LE: loop exit
PB: predicated region body
PF: predicated region fallthrough
CT: control target
= control target key end

     0   :  { %s64_s0 = inlined_call_operand.vmem [shape: f32[8,256], index: 0, kind: input, shape index: {}]   ;;  %s65_s1 = inlined_call_operand.vmem [shape: f32[8,256], index: 1, kind: output, shape index: {}]  }
   0x1   :  { %v8_v0 = vld [vmem:[%s64_s0] sm:$0xff]  ;;  %v9_v1 = vld [vmem:[%s64_s0 + $0x8] sm:$0xff] }
   0x2   :  { %v10_v2 = vmul.f32 1.442695, %v8_v0  ;;  %v12_v3 = vmul.f32 1.442695, %v9_v1 }
   0x4   :  { %36 = vpow2.f32 %v10_v2 }
   0x5   :  { %38 = vpow2.f32 %v12_v3 }
   0xe   :  { %v37_v4 = vpop.eup %36 }
   0xf   :  { %v39_v5 = vpop.eup %38 }
  0x10   :  { %v14_v6 = vadd.f32 %v39_v5, %v37_v4 }
  0x12   :  { %15 = vadd.xlane.f32.xlu0 %v14_v6 }
  0x9f   :  { %v16_v7 = vpop.xlane.xlu0 %15 }
  0xa0   :  { %v17_v8 = vrot.slane %v16_v7, 4 }
  0xa2   :  { %v18_v9 = vadd.f32 %v17_v8, %v16_v7 }
  0xa4   :  { %v19_v10 = vrot.slane %v18_v9, 2 }
  0xa6   :  { %v20_v11 = vadd.f32 %v19_v10, %v18_v9 }
  0xa8   :  { %v21_v12 = vrot.slane %v20_v11, 1 }
  0xaa   :  { %v22_v13 = vadd.f32 %v21_v12, %v20_v11 }
  0xac   :  { %34 = vpush %v22_v13 }
  0xdd   :  { %s35_s10 = spop %34 }
  0xde   :  { %v24_v14 = vstv %s35_s10 }
  0xdf   :  { %40 = vrcp.f32 %v24_v14 }
  0xe9   :  { %v41_v15 = vpop.eup %40 }
  0xea   :  { %v26_v16 = vmul.f32 %v41_v15, %v37_v4  ;;  %v27_v17 = vmul.f32 %v41_v15, %v39_v5 }
  0xec   :  { %28 = vst [vmem:[%s65_s1] sm:$0xff] %v26_v16  ;;  %29 = vst [vmem:[%s65_s1 + $0x8] sm:$0xff] %v27_v17 }

</bundles_post_ra>
